<compile_context>
chip_gen: v5e
topology: v5e:2x2
jax: 0.10.0
libtpu: 0.0.40
codegen_flags: <defaults>
</compile_context>

<pallas_src>
import functools

import jax
import jax.numpy as jnp
import numpy as np
from jax import lax
from jax.experimental import pallas as pl
from jax.experimental.pallas import tpu as pltpu


def _full_spec(shape):
    # Whole array resident in VMEM for the single grid step.
    return pl.BlockSpec(shape, lambda *_: (0,) * len(shape))


# -----------------------------------------------------------------------------
# Fused kernel: projections + self-attn scores + cross-attn scores + MLP.
# -----------------------------------------------------------------------------
def _mta_fused_kernel(xy_ref, wbig_ref, bbig_ref, wqsum_ref, qb_ref,
                      w1_ref, b1_ref, w2_ref, b2_ref, out_ref,
                      *, batch, seq, embed):
    B, S, E = batch, seq, embed
    N = B * S
    mm = wbig_ref.dtype                          # f32 or bf16 (weights pre-cast)
    inv_sqrt_e = 1.0 / float(E) ** 0.5           # SelfAttention scale
    inv_root4_e = 1.0 / float(E) ** 0.25         # CrossAttention scale (4th root)

    xy = xy_ref[...]                             # (N, 2E), matmul dtype

    # --- One fused MXU matmul: [x|y] @ blockdiag([wk1|wv1],[wk2|wv2]) --------
    kv = jnp.dot(xy, wbig_ref[...],
                 preferred_element_type=jnp.float32) + bbig_ref[...]   # (N,4E) f32
    kv3 = kv.reshape(B, S, 4 * E)
    k1 = kv3[:, :, 0 * E:1 * E]
    v1 = kv3[:, :, 1 * E:2 * E]
    k2 = kv3[:, :, 2 * E:3 * E]
    v2 = kv3[:, :, 3 * E:4 * E]

    # --- SelfAttention scores, q collapsed to its row-sum (VPU + XLU) --------
    # qsum[b,s] = sum_f (x@wq1 + bq1)[b,s,f] = x[b,s,:]·rowsum(wq1) + sum(bq1)
    wq1s = wqsum_ref[0:1, :]                     # (1, E) f32
    wq2s = wqsum_ref[1:2, :]                     # (1, E) f32
    x3 = xy[:, :E].astype(jnp.float32).reshape(B, S, E)
    qsum = jnp.sum(x3 * wq1s, axis=-1, keepdims=True) + qb_ref[0]      # (B,S,1)
    # scores_1[b,e] = sum_s k1[b,s,e]*qsum[b,s];  scores_2 = scores_1/sqrt(E)
    scores2 = jnp.sum(k1 * qsum, axis=1) * inv_sqrt_e                  # (B,E)

    # PyTorch broadcast v*(B,E) == v*(1,B,E): scores indexed by SEQUENCE pos
    # (S == B asserted wrapper-side).  x1 = v1 * scores2[None]; only its
    # row-sum against rowsum(wq2) is ever needed downstream:
    qcsum = jnp.sum(v1 * scores2[None, :, :] * wq2s, axis=-1,
                    keepdims=True) + qb_ref[1]                         # (B,S,1)

    # --- CrossAttention scores + apply (scores indexed by BATCH) -------------
    scoresc2 = jnp.sum(k2 * qcsum, axis=1) * inv_root4_e               # (B,E)
    att = (v2 * scoresc2[:, None, :]).reshape(N, E)                    # (N,E) f32

    # --- MLP: fc1 -> ReLU -> fc2 (fc2 zero-padded -> lane-dense final store) -
    # TODO(synk): attention dropouts never applied in the reference forward;
    #             MLP dropout is identity (eval mode).
    h = jnp.dot(att.astype(mm), w1_ref[...],
                preferred_element_type=jnp.float32) + b1_ref[...]
    h = jnp.maximum(h, 0.0)                      # ReLU (f32)
    out = jnp.dot(h.astype(mm), w2_ref[...],
                  preferred_element_type=jnp.float32) + b2_ref[...]
    out_ref[...] = out.astype(out_ref.dtype)


# -----------------------------------------------------------------------------
# One-time parameter packing (block-diag fusion, q row-sum collapse, fc2 pad).
# -----------------------------------------------------------------------------
def pack_mta_params(params, matmul_dtype=jnp.float32):
    """matmul_dtype=jnp.bfloat16 enables the bf16 MXU path on v5e/v6e/v7x;
    bias / score / ReLU math stays f32 in-kernel."""
    wd = jnp.dtype(matmul_dtype)
    f32 = jnp.float32
    E = params["wq1"].shape[0]

    # Block-diagonal fused projection weight for [x|y] (N, 2E).
    wx = jnp.concatenate([params["wk1"], params["wv1"]], axis=1)        # (E, 2E)
    wy = jnp.concatenate([params["wk2"], params["wv2"]], axis=1)        # (E, 2E)
    zero = jnp.zeros((E, 2 * E), f32)
    wbig = jnp.concatenate(
        [jnp.concatenate([wx, zero], axis=1),
         jnp.concatenate([zero, wy], axis=1)], axis=0)                  # (2E, 4E)
    bbig = jnp.concatenate([params["bk1"], params["bv1"],
                            params["bk2"], params["bv2"]], axis=1)      # (1, 4E)

    # q projections collapsed: only row-sums of q are used downstream.
    wqsum = jnp.stack([jnp.sum(params["wq1"], axis=1),
                       jnp.sum(params["wq2"], axis=1)], axis=0).astype(f32)  # (2,E)
    qb = jnp.stack([jnp.sum(params["bq1"]),
                    jnp.sum(params["bq2"])]).astype(f32)                # (2,) -> SMEM

    # MLP; pad fc2 columns to a 128-lane multiple for an unmasked final store.
    w1, b1, w2, b2 = params["w1"], params["b1"], params["w2"], params["b2"]
    out_features = w2.shape[1]
    opad = ((out_features + 127) // 128) * 128
    if opad != out_features:
        w2 = jnp.pad(w2, ((0, 0), (0, opad - out_features)))
        b2 = jnp.pad(b2, ((0, 0), (0, opad - out_features)))

    return {
        "wbig": wbig.astype(wd), "bbig": bbig.astype(f32),
        "wqsum": wqsum, "qb": qb,
        "w1": w1.astype(wd), "b1": b1.astype(f32),
        "w2": w2.astype(wd), "b2": b2.astype(f32),
        "out_features": out_features,          # static python int (shape-derived)
    }


def mta_forward(x, y, packed):
    """x, y: (B, S, E) float32.  packed: output of pack_mta_params."""
    B, S, E = x.shape
    assert S == B, "PyTorch SelfAttention broadcast requires seq_len == batch"
    assert packed["w1"].shape[0] == E, "mlp_input must equal embed_size"
    N = B * S
    mm = packed["wbig"].dtype
    hidden = packed["w1"].shape[1]
    opad = packed["w2"].shape[1]
    out_features = packed["out_features"]

    # Pre-cast activations to the matmul dtype wrapper-side (halves activation
    # DMA bytes in bf16 mode); the kernel promotes to f32 for score/VPU math.
    xy = jnp.concatenate([x.reshape(N, E), y.reshape(N, E)], axis=1).astype(mm)

    args = (xy, packed["wbig"], packed["bbig"], packed["wqsum"], packed["qb"],
            packed["w1"], packed["b1"], packed["w2"], packed["b2"])

    in_specs = [
        _full_spec(xy.shape),
        _full_spec(packed["wbig"].shape),
        _full_spec(packed["bbig"].shape),
        _full_spec(packed["wqsum"].shape),
        pl.BlockSpec(memory_space=pltpu.MemorySpace.SMEM),   # (2,) bias row-sums
        _full_spec(packed["w1"].shape),
        _full_spec(packed["b1"].shape),
        _full_spec(packed["w2"].shape),
        _full_spec(packed["b2"].shape),
    ]

    flops = (2 * N * (2 * E) * (4 * E)       # fused block-diag projection matmul
             + 2 * N * E * hidden            # fc1
             + 2 * N * hidden * opad)        # fc2
    io_bytes = (sum(int(a.size) * a.dtype.itemsize for a in args)
                + N * opad * 4)
    # Explicit VMEM budget (v7x: 64 MiB physical / 32 MiB scoped default).
    vmem_limit = int(min(64 * 1024 * 1024,
                         max(4 * 1024 * 1024, 4 * io_bytes)))

    out_pad = pl.pallas_call(
        functools.partial(_mta_fused_kernel, batch=B, seq=S, embed=E),
        out_shape=jax.ShapeDtypeStruct((N, opad), jnp.float32),
        grid=(1,),
        in_specs=in_specs,
        out_specs=_full_spec((N, opad)),
        compiler_params=pltpu.CompilerParams(
            dimension_semantics=("arbitrary",),
            vmem_limit_bytes=vmem_limit),
        cost_estimate=pl.CostEstimate(flops=flops, transcendentals=0,
                                      bytes_accessed=io_bytes),
    )(*args)

    out = out_pad[:, :out_features] if opad != out_features else out_pad
    return out.reshape(B, S, out_features)


# -----------------------------------------------------------------------------
# Pure-JAX reference (mirrors the PyTorch module exactly; highest precision).
# -----------------------------------------------------------------------------
def mta_reference(x, y, prm):
    E = x.shape[-1]
    hp = lax.Precision.HIGHEST

    def lin(a, w, b):
        return jnp.dot(a, w, precision=hp) + b

    q = lin(x, prm["wq1"], prm["bq1"])
    k = lin(x, prm["wk1"], prm["bk1"])
    v = lin(x, prm["wv1"], prm["bv1"])
    scores = jnp.einsum("bse,bsf->bef", k, q, precision=hp)
    s2 = jnp.sum(scores, -1) / jnp.sqrt(jnp.float32(E))
    x1 = v * s2[None, :, :]

    q = lin(x1, prm["wq2"], prm["bq2"])
    k = lin(y, prm["wk2"], prm["bk2"])
    v = lin(y, prm["wv2"], prm["bv2"])
    scores = jnp.einsum("bse,bsf->bef", k, q, precision=hp)
    s2 = jnp.sum(scores, -1) / jnp.sqrt(jnp.sqrt(jnp.float32(E)))
    att = v * s2[:, None, :]

    h = jnp.maximum(lin(att, prm["w1"], prm["b1"]), 0.0)
    return lin(h, prm["w2"], prm["b2"])


# -----------------------------------------------------------------------------
# Deterministic parameter construction (shapes from MTA.__init__).
# -----------------------------------------------------------------------------
def make_params(key, embed_dim, mlp_input, mlp_ratio, mlp_output):
    hidden = mlp_input * mlp_ratio
    names_shapes = [
        ("wq1", (embed_dim, embed_dim)), ("bq1", (1, embed_dim)),
        ("wk1", (embed_dim, embed_dim)), ("bk1", (1, embed_dim)),
        ("wv1", (embed_dim, embed_dim)), ("bv1", (1, embed_dim)),
        ("wq2", (embed_dim, embed_dim)), ("bq2", (1, embed_dim)),
        ("wk2", (embed_dim, embed_dim)), ("bk2", (1, embed_dim)),
        ("wv2", (embed_dim, embed_dim)), ("bv2", (1, embed_dim)),
        ("w1", (mlp_input, hidden)),     ("b1", (1, hidden)),
        ("w2", (hidden, mlp_output)),    ("b2", (1, mlp_output)),
    ]
    keys = jax.random.split(key, len(names_shapes))
    params = {}
    for (name, shape), k in zip(names_shapes, keys):
        params[name] = (0.05 * jax.random.normal(k, shape)).astype(jnp.float32)
    return params


if __name__ == "__main__":
    setting = {
        "embed_size": 32,
        "heads": 4,           # unused by the reference forward pass
        "mlp_input": 32,      # must equal embed_size (MLP consumes attention out)
        "mlp_ratio": 2,
        "mlp_output": 32,
        "attn_dropout": 0.1,  # identity in eval; never applied in attention anyway
    }

    B = S = 8                 # S == B required by the PyTorch broadcast semantics
    E = setting["embed_size"]

    key = jax.random.PRNGKey(0)
    kx, ky, kp = jax.random.split(key, 3)
    x = jax.random.normal(kx, (B, S, E), dtype=jnp.float32)
    y = jax.random.normal(ky, (B, S, E), dtype=jnp.float32)
    params = make_params(kp, E, setting["mlp_input"], setting["mlp_ratio"],
                         setting["mlp_output"])

    ref = jax.block_until_ready(mta_reference(x, y, params))

    # f32 matmul path.
    packed_f32 = pack_mta_params(params, matmul_dtype=jnp.float32)
    out_f32 = jax.block_until_ready(mta_forward(x, y, packed_f32))
    np.testing.assert_allclose(np.asarray(out_f32), np.asarray(ref),
                               rtol=2e-3, atol=2e-3)

    # bf16 matmul path (valid on v5e/v6e/v7x); score / bias / ReLU math stays f32.
    packed_bf16 = pack_mta_params(params, matmul_dtype=jnp.bfloat16)
    out_bf16 = jax.block_until_ready(mta_forward(x, y, packed_bf16))
    np.testing.assert_allclose(np.asarray(out_bf16), np.asarray(ref),
                               rtol=2e-2, atol=2e-2)

    print("KERNEL_OK")
</pallas_src>

<mosaic_0001>
module attributes {stable_mosaic.version = 11 : i64} {
  func.func @_mta_fused_kernel(%arg0: i32, %arg1: memref<64x64xf32, #tpu.memory_space<vmem>>, %arg2: memref<64x128xf32, #tpu.memory_space<vmem>>, %arg3: memref<1x128xf32, #tpu.memory_space<vmem>>, %arg4: memref<2x32xf32, #tpu.memory_space<vmem>>, %arg5: memref<2xf32, #tpu.memory_space<smem>>, %arg6: memref<32x64xf32, #tpu.memory_space<vmem>>, %arg7: memref<1x64xf32, #tpu.memory_space<vmem>>, %arg8: memref<64x128xf32, #tpu.memory_space<vmem>>, %arg9: memref<1x128xf32, #tpu.memory_space<vmem>>, %arg10: memref<64x128xf32, #tpu.memory_space<vmem>>) attributes {dimension_semantics = [#tpu.dimension_semantics<arbitrary>], iteration_bounds = array<i64: 1>, scalar_prefetch = 0 : i64, scratch_operands = 0 : i64, tpu.core_type = #tpu.core_type<tc>, window_params = [{pipeline_mode = #tpu.pipeline_mode<synchronous>, transform_indices = @transform_0, window_bounds = array<i64: 64, 64>}, {pipeline_mode = #tpu.pipeline_mode<synchronous>, transform_indices = @transform_1, window_bounds = array<i64: 64, 128>}, {pipeline_mode = #tpu.pipeline_mode<synchronous>, transform_indices = @transform_2, window_bounds = array<i64: 1, 128>}, {pipeline_mode = #tpu.pipeline_mode<synchronous>, transform_indices = @transform_3, window_bounds = array<i64: 2, 32>}, {transform_indices = @transform_4, window_bounds = array<i64: 2>}, {pipeline_mode = #tpu.pipeline_mode<synchronous>, transform_indices = @transform_5, window_bounds = array<i64: 32, 64>}, {pipeline_mode = #tpu.pipeline_mode<synchronous>, transform_indices = @transform_6, window_bounds = array<i64: 1, 64>}, {pipeline_mode = #tpu.pipeline_mode<synchronous>, transform_indices = @transform_7, window_bounds = array<i64: 64, 128>}, {pipeline_mode = #tpu.pipeline_mode<synchronous>, transform_indices = @transform_8, window_bounds = array<i64: 1, 128>}, {pipeline_mode = #tpu.pipeline_mode<synchronous>, transform_indices = @transform_9, window_bounds = array<i64: 64, 128>}]} {
    %c0 = arith.constant 0 : index
    %c0_0 = arith.constant 0 : index
    %0 = vector.load %arg1[%c0, %c0_0] : memref<64x64xf32, #tpu.memory_space<vmem>>, vector<64x64xf32>
    %c0_1 = arith.constant 0 : index
    %c0_2 = arith.constant 0 : index
    %1 = vector.load %arg2[%c0_1, %c0_2] : memref<64x128xf32, #tpu.memory_space<vmem>>, vector<64x128xf32>
    %cst = arith.constant dense<0.000000e+00> : vector<64x128xf32>
    %2 = tpu.matmul %0, %1, %cst {dimension_numbers = #tpu.dot_dimension_numbers<[1], [0], [0], [1], [0, 0, 1, 1], [], []>} : vector<64x64xf32>, vector<64x128xf32>, vector<64x128xf32> -> vector<64x128xf32>
    %c0_3 = arith.constant 0 : index
    %c0_4 = arith.constant 0 : index
    %3 = vector.load %arg3[%c0_3, %c0_4] : memref<1x128xf32, #tpu.memory_space<vmem>>, vector<1x128xf32>
    %4 = vector.broadcast %3 : vector<1x128xf32> to vector<64x128xf32>
    %5 = arith.addf %2, %4 : vector<64x128xf32>
    %6 = vector.shape_cast %5 : vector<64x128xf32> to vector<8x8x128xf32>
    %7 = vector.extract_strided_slice %6 {offsets = [0, 0, 0], sizes = [8, 8, 32], strides = [1, 1, 1]} : vector<8x8x128xf32> to vector<8x8x32xf32>
    %8 = vector.extract_strided_slice %6 {offsets = [0, 0, 32], sizes = [8, 8, 32], strides = [1, 1, 1]} : vector<8x8x128xf32> to vector<8x8x32xf32>
    %9 = vector.extract_strided_slice %6 {offsets = [0, 0, 64], sizes = [8, 8, 32], strides = [1, 1, 1]} : vector<8x8x128xf32> to vector<8x8x32xf32>
    %10 = vector.extract_strided_slice %6 {offsets = [0, 0, 96], sizes = [8, 8, 32], strides = [1, 1, 1]} : vector<8x8x128xf32> to vector<8x8x32xf32>
    %c0_5 = arith.constant 0 : index
    %c0_6 = arith.constant 0 : index
    %11 = vector.load %arg4[%c0_5, %c0_6] : memref<2x32xf32, #tpu.memory_space<vmem>>, vector<1x32xf32>
    %c1 = arith.constant 1 : index
    %c0_7 = arith.constant 0 : index
    %12 = vector.load %arg4[%c1, %c0_7] : memref<2x32xf32, #tpu.memory_space<vmem>>, vector<1x32xf32>
    %13 = vector.extract_strided_slice %0 {offsets = [0, 0], sizes = [64, 32], strides = [1, 1]} : vector<64x64xf32> to vector<64x32xf32>
    %14 = vector.shape_cast %13 : vector<64x32xf32> to vector<8x8x32xf32>
    %15 = vector.shape_cast %11 : vector<1x32xf32> to vector<1x1x32xf32>
    %16 = vector.broadcast %15 : vector<1x1x32xf32> to vector<8x8x32xf32>
    %17 = arith.mulf %14, %16 : vector<8x8x32xf32>
    %cst_8 = arith.constant dense<0.000000e+00> : vector<8x8xf32>
    %18 = vector.multi_reduction <add>, %17, %cst_8 [2] : vector<8x8x32xf32> to vector<8x8xf32>
    %19 = vector.shape_cast %18 : vector<8x8xf32> to vector<8x8x1xf32>
    %c0_9 = arith.constant 0 : index
    %20 = memref.load %arg5[%c0_9] : memref<2xf32, #tpu.memory_space<smem>>
    %21 = vector.broadcast %20 : f32 to vector<8x8x1xf32>
    %22 = arith.addf %19, %21 : vector<8x8x1xf32>
    %23 = vector.broadcast %22 : vector<8x8x1xf32> to vector<8x8x32xf32>
    %24 = arith.mulf %7, %23 : vector<8x8x32xf32>
    %cst_10 = arith.constant dense<0.000000e+00> : vector<8x32xf32>
    %25 = vector.multi_reduction <add>, %24, %cst_10 [1] : vector<8x8x32xf32> to vector<8x32xf32>
    %cst_11 = arith.constant 0.176776692 : f32
    %26 = vector.broadcast %cst_11 : f32 to vector<8x32xf32>
    %27 = arith.mulf %25, %26 : vector<8x32xf32>
    %28 = vector.shape_cast %27 : vector<8x32xf32> to vector<1x8x32xf32>
    %29 = vector.broadcast %28 : vector<1x8x32xf32> to vector<8x8x32xf32>
    %30 = arith.mulf %8, %29 : vector<8x8x32xf32>
    %31 = vector.shape_cast %12 : vector<1x32xf32> to vector<1x1x32xf32>
    %32 = vector.broadcast %31 : vector<1x1x32xf32> to vector<8x8x32xf32>
    %33 = arith.mulf %30, %32 : vector<8x8x32xf32>
    %cst_12 = arith.constant dense<0.000000e+00> : vector<8x8xf32>
    %34 = vector.multi_reduction <add>, %33, %cst_12 [2] : vector<8x8x32xf32> to vector<8x8xf32>
    %35 = vector.shape_cast %34 : vector<8x8xf32> to vector<8x8x1xf32>
    %c1_13 = arith.constant 1 : index
    %36 = memref.load %arg5[%c1_13] : memref<2xf32, #tpu.memory_space<smem>>
    %37 = vector.broadcast %36 : f32 to vector<8x8x1xf32>
    %38 = arith.addf %35, %37 : vector<8x8x1xf32>
    %39 = vector.broadcast %38 : vector<8x8x1xf32> to vector<8x8x32xf32>
    %40 = arith.mulf %9, %39 : vector<8x8x32xf32>
    %cst_14 = arith.constant dense<0.000000e+00> : vector<8x32xf32>
    %41 = vector.multi_reduction <add>, %40, %cst_14 [1] : vector<8x8x32xf32> to vector<8x32xf32>
    %cst_15 = arith.constant 0.420448214 : f32
    %42 = vector.broadcast %cst_15 : f32 to vector<8x32xf32>
    %43 = arith.mulf %41, %42 : vector<8x32xf32>
    %44 = vector.shape_cast %43 : vector<8x32xf32> to vector<8x1x32xf32>
    %45 = vector.broadcast %44 : vector<8x1x32xf32> to vector<8x8x32xf32>
    %46 = arith.mulf %10, %45 : vector<8x8x32xf32>
    %47 = vector.shape_cast %46 : vector<8x8x32xf32> to vector<64x32xf32>
    %c0_16 = arith.constant 0 : index
    %c0_17 = arith.constant 0 : index
    %48 = vector.load %arg6[%c0_16, %c0_17] : memref<32x64xf32, #tpu.memory_space<vmem>>, vector<32x64xf32>
    %cst_18 = arith.constant dense<0.000000e+00> : vector<64x64xf32>
    %49 = tpu.matmul %47, %48, %cst_18 {dimension_numbers = #tpu.dot_dimension_numbers<[1], [0], [0], [1], [0, 0, 1, 1], [], []>} : vector<64x32xf32>, vector<32x64xf32>, vector<64x64xf32> -> vector<64x64xf32>
    %c0_19 = arith.constant 0 : index
    %c0_20 = arith.constant 0 : index
    %50 = vector.load %arg7[%c0_19, %c0_20] : memref<1x64xf32, #tpu.memory_space<vmem>>, vector<1x64xf32>
    %51 = vector.broadcast %50 : vector<1x64xf32> to vector<64x64xf32>
    %52 = arith.addf %49, %51 : vector<64x64xf32>
    %cst_21 = arith.constant 0.000000e+00 : f32
    %53 = vector.broadcast %cst_21 : f32 to vector<64x64xf32>
    %54 = arith.maximumf %52, %53 : vector<64x64xf32>
    %c0_22 = arith.constant 0 : index
    %c0_23 = arith.constant 0 : index
    %55 = vector.load %arg8[%c0_22, %c0_23] : memref<64x128xf32, #tpu.memory_space<vmem>>, vector<64x128xf32>
    %cst_24 = arith.constant dense<0.000000e+00> : vector<64x128xf32>
    %56 = tpu.matmul %54, %55, %cst_24 {dimension_numbers = #tpu.dot_dimension_numbers<[1], [0], [0], [1], [0, 0, 1, 1], [], []>} : vector<64x64xf32>, vector<64x128xf32>, vector<64x128xf32> -> vector<64x128xf32>
    %c0_25 = arith.constant 0 : index
    %c0_26 = arith.constant 0 : index
    %57 = vector.load %arg9[%c0_25, %c0_26] : memref<1x128xf32, #tpu.memory_space<vmem>>, vector<1x128xf32>
    %58 = vector.broadcast %57 : vector<1x128xf32> to vector<64x128xf32>
    %59 = arith.addf %56, %58 : vector<64x128xf32>
    %c0_27 = arith.constant 0 : index
    %c0_28 = arith.constant 0 : index
    %60 = vector.load %arg10[%c0_27, %c0_28] : memref<64x128xf32, #tpu.memory_space<vmem>>, vector<64x128xf32>
    tpu.vector_store %arg10[%c0_27, %c0_28], %59 {strides = array<i32>} : memref<64x128xf32, #tpu.memory_space<vmem>>, vector<64x128xf32>,
    return
  }
  func.func @transform_0(%arg0: i32) -> (i32, i32) {
    %c0_i32 = arith.constant 0 : i32
    %c0_i32_0 = arith.constant 0 : i32
    %c0_i32_1 = arith.constant 0 : i32
    return %c0_i32, %c0_i32_0 : i32, i32
  }
  func.func @transform_1(%arg0: i32) -> (i32, i32) {
    %c0_i32 = arith.constant 0 : i32
    %c0_i32_0 = arith.constant 0 : i32
    %c0_i32_1 = arith.constant 0 : i32
    return %c0_i32, %c0_i32_0 : i32, i32
  }
  func.func @transform_2(%arg0: i32) -> (i32, i32) {
    %c0_i32 = arith.constant 0 : i32
    %c0_i32_0 = arith.constant 0 : i32
    %c0_i32_1 = arith.constant 0 : i32
    return %c0_i32, %c0_i32_0 : i32, i32
  }
  func.func @transform_3(%arg0: i32) -> (i32, i32) {
    %c0_i32 = arith.constant 0 : i32
    %c0_i32_0 = arith.constant 0 : i32
    %c0_i32_1 = arith.constant 0 : i32
    return %c0_i32, %c0_i32_0 : i32, i32
  }
  func.func @transform_4(%arg0: i32) -> i32 {
    %c0_i32 = arith.constant 0 : i32
    %c0_i32_0 = arith.constant 0 : i32
    return %c0_i32 : i32
  }
  func.func @transform_5(%arg0: i32) -> (i32, i32) {
    %c0_i32 = arith.constant 0 : i32
    %c0_i32_0 = arith.constant 0 : i32
    %c0_i32_1 = arith.constant 0 : i32
    return %c0_i32, %c0_i32_0 : i32, i32
  }
  func.func @transform_6(%arg0: i32) -> (i32, i32) {
    %c0_i32 = arith.constant 0 : i32
    %c0_i32_0 = arith.constant 0 : i32
    %c0_i32_1 = arith.constant 0 : i32
    return %c0_i32, %c0_i32_0 : i32, i32
  }
  func.func @transform_7(%arg0: i32) -> (i32, i32) {
    %c0_i32 = arith.constant 0 : i32
    %c0_i32_0 = arith.constant 0 : i32
    %c0_i32_1 = arith.constant 0 : i32
    return %c0_i32, %c0_i32_0 : i32, i32
  }
  func.func @transform_8(%arg0: i32) -> (i32, i32) {
    %c0_i32 = arith.constant 0 : i32
    %c0_i32_0 = arith.constant 0 : i32
    %c0_i32_1 = arith.constant 0 : i32
    return %c0_i32, %c0_i32_0 : i32, i32
  }
  func.func @transform_9(%arg0: i32) -> (i32, i32) {
    %c0_i32 = arith.constant 0 : i32
    %c0_i32_0 = arith.constant 0 : i32
    %c0_i32_1 = arith.constant 0 : i32
    return %c0_i32, %c0_i32_0 : i32, i32
  }
}

</mosaic_0001>

<bundles_post_ra>
// kernel: tpu_custom_call.1
= control target key start
LH: loop header
LB: loop body
LE: loop exit
PB: predicated region body
PF: predicated region fallthrough
CT: control target
= control target key end

     0   :  { %14 = vsyncpa [#allocation3], 0  ;;  %s1219_s0 = inlined_call_operand.hbm [shape: f32[64,64], index: 0, kind: input, shape index: {}]   ;;  %s1220_s1 = inlined_call_operand.hbm [shape: f32[64,128], index: 1, kind: input, shape index: {}]   ;;  %s1221_s2 = inlined_call_operand.hbm [shape: f32[1,128], index: 2, kind: input, shape index: {}]   ;;  %s1222_s3 = inlined_call_operand.vmem [shape: f32[2,32], index: 3, kind: input, shape index: {}]   ;;  %s1223_s4 = inlined_call_operand.vmem [shape: f32[2], index: 4, kind: input, shape index: {}]   ;;  %s1224_s5 = inlined_call_operand.hbm [shape: f32[32,64], index: 5, kind: input, shape index: {}]   ;;  %s1225_s6 = inlined_call_operand.vmem [shape: f32[1,64], index: 6, kind: input, shape index: {}]   ;;  %s1226_s7 = inlined_call_operand.hbm [shape: f32[64,128], index: 7, kind: input, shape index: {}]   ;;  %s1227_s8 = inlined_call_operand.vmem [shape: f32[1,128], index: 8, kind: input, shape index: {}]   ;;  %s1228_s9 = inlined_call_operand.hbm [shape: f32[64,128], index: 9, kind: output, shape index: {}]  }
   0x1   :  { %15 = vsyncpa [#allocation7], 0 }
   0x2   :  { %16 = vsyncpa [#allocation5], 0 }
   0x3   :  { %17 = vsyncpa [#allocation11], 0 }
   0x4   :  { %18 = vsyncpa [#allocation4], 0  ;;  %s36_s11 = sshll.u32 %s1220_s1, 4  ;;  %s978_s12 = smov [#allocation6]   ;;  %s37_s11 = int_to_ptr.hbm [resolvable:$true] %s36_s11 }
   0x5   :  { %s38_s13 = sshll.u32 %s978_s12, 4  ;;  %s71_s16 = sshll.u32 %s1224_s5, 4  ;;  %s39_s13 = int_to_ptr.vmem [resolvable:$true] %s38_s13  ;;  %s72_s16 = int_to_ptr.hbm [resolvable:$true] %s71_s16 }
   0x6   :  { %s979_s17 = smov 128   ;;  %s980_s18 = smov 8  }
   0x7   :  { %44 = dma.hbm_to_vmem [thread:$0]  %s37_s11, 1024, %s39_s13, [#allocation7], %s979_s17, %s979_s17, %s980_s18  }
   0x8   :  { %s981_s19 = smov [#allocation10]   ;;  %s23_s1 = sshll.u32 %s1219_s0, 4  ;;  %s24_s1 = int_to_ptr.hbm [resolvable:$true] %s23_s1 }
   0x9   :  { %s73_s20 = sshll.u32 %s981_s19, 4  ;;  %s50_s24 = sshll.u32 %s1221_s2, 4  ;;  %s74_s20 = int_to_ptr.vmem [resolvable:$true] %s73_s20  ;;  %s51_s24 = int_to_ptr.hbm [resolvable:$true] %s50_s24 }
   0xa   :  { %79 = dma.hbm_to_vmem [thread:$0]  %s72_s16, 512, %s74_s20, [#allocation11], %s979_s17, %s979_s17, %s980_s18  }
   0xb   :  { %s982_s25 = smov [#allocation2]   ;;  %s983_s27 = smov [#allocation8]  }
   0xc   :  { %s25_s26 = sshll.u32 %s982_s25, 4  ;;  %s52_s0 = sshll.u32 %s983_s27, 4  ;;  %s26_s26 = int_to_ptr.vmem [resolvable:$true] %s25_s26  ;;  %s53_s0 = int_to_ptr.vmem [resolvable:$true] %s52_s0 }
   0xd   :  { %31 = dma.hbm_to_vmem [thread:$0]  %s24_s1, 1024, %s26_s26, [#allocation3], %s979_s17, %s979_s17, %s980_s18  }
   0xe   :  { %s63_s30 = sshll.u32 %s1223_s4, 4  ;;  %s86_s2 = sshll.u32 %s1226_s7, 4  ;;  %s64_s30 = int_to_ptr.vmem [resolvable:$true] %s63_s30  ;;  %s87_s2 = int_to_ptr.hbm [resolvable:$true] %s86_s2 }
   0xf   :  { %55 = dma.hbm_to_vmem [thread:$0]  %s51_s24, 16, %s53_s0, [#allocation7]  }
  0x10   :  { %s984_s12 = smov [#allocation9]   ;;  %s985_s13 = smov [#allocation12]  }
  0x11   :  { %66 = dma.vmem_to_smem %s64_s30, 16, %s984_s12, [#allocation5]  }
  0x12   :  { %s88_s14 = sshll.u32 %s985_s13, 4  ;;  %s89_s14 = int_to_ptr.vmem [resolvable:$true] %s88_s14 }
  0x13   :  { %94 = dma.hbm_to_vmem [thread:$0]  %s87_s2, 1024, %s89_s14, [#allocation11], %s979_s17, %s979_s17, %s980_s18  }
  0x14   :  { %968 = dma.done.wait [#allocation3], 1024  }
  0x15   :  { %969 = vsyncadd [#allocation3], 4294966272 }
  0x16   :  { %970 = dma.done.wait [#allocation7], 1040  }
  0x17   :  { %971 = vsyncadd [#allocation7], 4294966256 }
  0x18   :  { %972 = dma.done.wait [#allocation5], 16  }
  0x19   :  { %973 = vsyncadd [#allocation5], 4294967280 }
  0x1a   :  { %974 = dma.done.wait [#allocation11], 1536  }
  0x1b   :  { %975 = vsyncadd [#allocation11], 4294965760 }
  0x1c   :  { %121 = sfence }
  0x1d   :  { %v137_v0 = vld [vmem:[#allocation6 + $0x38] sm:$0xff]  ;;  %v136_v1 = vld [vmem:[#allocation6 + $0x30] sm:$0xff]  ;;  %v135_v2 = vld [vmem:[#allocation6 + $0x28] sm:$0xff]  ;;  %vm219_vm0 = vcmask 261120   ;;  %vm142_vm1 = vcmask 523264   ;;  %s244_s19 = sld [smem:[#allocation9]] }
  0x1e   :  { %175 = vmatpush.msra.mxu0 %v137_v0  ;;  %780 = vmatpush.msra.mxu3 %v137_v0  ;;  %v807_v3 = vld [vmem:[%s1222_s3] ss:$0 sm:$0xff]  ;;  %v133_v7 = vld [vmem:[#allocation6 + $0x18] sm:$0xff]  ;;  %v124_v8 = vld [vmem:[#allocation2 + $0x10] sm:$0xff]  ;;  %s986_s20 = smov 32   ;;  %vm334_vm2 = vcmask 1041409  }
  0x1f   :  { %v134_v4 = vld [vmem:[#allocation6 + $0x20] sm:$0xff]  ;;  %v213_v10 = vmul.f32 %v807_v3, %v124_v8  ;;  %v132_v11 = vld [vmem:[#allocation6 + $0x10] sm:$0xff]  ;;  %v123_v12 = vld [vmem:[#allocation2 + $0x8] sm:$0xff]  ;;  %vm336_vm3 = vcmask 1042434   ;;  %vm338_vm4 = vcmask 1043459   ;;  %vm340_vm5 = vcmask 1044484  }
  0x20   :  { %176 = vmatpush.msra.mxu0 %v136_v1  ;;  %781 = vmatpush.msra.mxu3 %v136_v1  ;;  %v122_v5 = vld [vmem:[#allocation2] sm:$0xff]  ;;  %v212_v13 = vmul.f32 %v807_v3, %v123_v12  ;;  %v131_v15 = vld [vmem:[#allocation6 + $0x8] sm:$0xff]  ;;  %v128_v18 = vld [vmem:[#allocation2 + $0x30] sm:$0xff]  ;;  %vm342_vm6 = vcmask 1045509   ;;  %vm344_vm7 = vcmask 1046534   ;;  %vm346_vm8 = vcmask 1047559  }
  0x21   :  { %v211_v6 = vmul.f32 %v807_v3, %v122_v5  ;;  %v226_v14 = vsel %vm219_vm0, %v213_v10, 0.0  ;;  %v130_v16 = vld [vmem:[#allocation6] sm:$0xff]  ;;  %v125_v19 = vld [vmem:[#allocation2 + $0x18] sm:$0xff]  ;;  %v217_v22 = vmul.f32 %v807_v3, %v128_v18  ;;  %v127_v29 = vld [vmem:[#allocation2 + $0x28] sm:$0xff]  ;;  %s763_s21 = sld [smem:[#allocation9 + $0x1]]  ;;  %vm446_vm9 = vcmask 785920  }
  0x22   :  { %177 = vmatpush.msra.mxu0 %v135_v2  ;;  %782 = vmatpush.msra.mxu3 %v135_v2  ;;  %v223_v17 = vsel %vm219_vm0, %v212_v13, 0.0  ;;  %v214_v20 = vmul.f32 %v807_v3, %v125_v19  ;;  %v129_v24 = vld [vmem:[#allocation2 + $0x38] sm:$0xff]  ;;  %v126_v25 = vld [vmem:[#allocation2 + $0x20] sm:$0xff]  ;;  %v216_v31 = vmul.f32 %v807_v3, %v127_v29  ;;  %s739_s26 = sshll.u32 %s1228_s9, 4  ;;  %s740_s26 = int_to_ptr.hbm [resolvable:$true] %s739_s26 }
  0x23   :  { %v220_v9 = vsel %vm219_vm0, %v211_v6, 0.0  ;;  %227 = vadd.xlane.f32.xlu1 %v226_v14  ;;  %v238_v23 = vsel %vm219_vm0, %v217_v22, 0.0  ;;  %v215_v26 = vmul.f32 %v807_v3, %v126_v25  ;;  %v218_v27 = vmul.f32 %v807_v3, %v129_v24  ;;  %v809_v36 = vld [vmem:[%s1222_s3 + $0x1] ss:$0 sm:$0xff]  ;;  %v808_v41 = vld [vmem:[#allocation8] ss:$0 sm:$0xff] }
  0x24   :  { %178 = vmatpush.msra.mxu0 %v134_v4  ;;  %783 = vmatpush.msra.mxu3 %v134_v4  ;;  %v229_v21 = vsel %vm219_vm0, %v214_v20, 0.0  ;;  %v235_v32 = vsel %vm219_vm0, %v216_v31, 0.0  ;;  %v245_v42 = vstv %s244_s19  ;;  %s987_s3 = smov 96  }
  0x25   :  { %221 = vadd.xlane.f32.xlu0 %v220_v9  ;;  %v232_v28 = vsel %vm219_vm0, %v215_v26, 0.0  ;;  %v241_v30 = vsel %vm219_vm0, %v218_v27, 0.0 }
  0x26   :  { %179 = vmatpush.msra.mxu0 %v133_v7  ;;  %784 = vmatpush.msra.mxu3 %v133_v7 }
  0x27   :  { %233 = vadd.xlane.f32.xlu2 %v232_v28 }
  0x28   :  { %180 = vmatpush.msra.mxu0 %v132_v11  ;;  %785 = vmatpush.msra.mxu3 %v132_v11 }
  0x2a   :  { %181 = vmatpush.msra.mxu0 %v131_v15  ;;  %786 = vmatpush.msra.mxu3 %v131_v15 }
  0x2b   :  { %230 = vadd.xlane.f32.xlu1 %v229_v21 }
  0x2c   :  { %182 = vmatpush.msra.mxu0 %v130_v16  ;;  %787 = vmatpush.msra.mxu3 %v130_v16 }
  0x2d   :  { %755 = vmatmul.msk.f32.vlgmr.msra.gmra.mxu0 %vm142_vm1, %v122_v5  ;;  %224 = vadd.xlane.f32.xlu0 %v223_v17 }
  0x2e   :  { %761 = vmatmul.msk.f32.vlgmr.msra.gmra.mxu3 %vm142_vm1, %v128_v18 }
  0x2f   :  { %236 = vadd.xlane.f32.xlu2 %v235_v32 }
  0x33   :  { %242 = vadd.xlane.f32.xlu1 %v241_v30 }
  0x35   :  { %756 = vmatmul.msk.f32.gmra.mxu0 %vm142_vm1, %v123_v12  ;;  %239 = vadd.xlane.f32.xlu0 %v238_v23 }
  0x36   :  { %762 = vmatmul.msk.f32.gmra.mxu3 %vm142_vm1, %v129_v24 }
  0x3d   :  { %757 = vmatmul.msk.f32.gmra.mxu0 %vm142_vm1, %v124_v8 }
  0x45   :  { %758 = vmatmul.msk.f32.gmra.mxu0 %vm142_vm1, %v125_v19 }
  0x49   :  { %361 = vrot.lane.b32.xlu0 %v809_v36, %s986_s20 }
  0x4d   :  { %759 = vmatmul.msk.f32.gmra.mxu0 %vm142_vm1, %v126_v25 }
  0x55   :  { %760 = vmatmul.msk.f32.gmra.mxu0 %vm142_vm1, %v127_v29 }
  0x96   :  { %v228_v35 = vpop.xlane.xlu1 %227 }
  0x97   :  { %v248_v46 = vadd.f32 %v245_v42, %v228_v35 }
  0x98   :  { %v222_v34 = vpop.xlane.xlu0 %221 }
  0x99   :  { %v246_v48 = vadd.f32 %v245_v42, %v222_v34 }
  0x9a   :  { %v234_v1 = vpop.xlane.xlu2 %233 }
  0x9b   :  { %v250_v11 = vadd.f32 %v245_v42, %v234_v1 }
  0x9e   :  { %v231_v40 = vpop.xlane.xlu1 %230 }
  0x9f   :  { %v249_v56 = vadd.f32 %v245_v42, %v231_v40 }
  0xa0   :  { %v225_v39 = vpop.xlane.xlu0 %224 }
  0xa1   :  { %v247_v44 = vadd.f32 %v245_v42, %v225_v39 }
  0xa2   :  { %v237_v24 = vpop.xlane.xlu2 %236 }
  0xa3   :  { %v251_v31 = vadd.f32 %v245_v42, %v237_v24 }
  0xa6   :  { %v243_v54 = vpop.xlane.xlu1 %242 }
  0xa7   :  { %v253_v63 = vadd.f32 %v245_v42, %v243_v54 }
  0xa8   :  { %v240_v51 = vpop.xlane.xlu0 %239 }
  0xa9   :  { %v252_v59 = vadd.f32 %v245_v42, %v240_v51 }
  0xaa   :  { %v184_v33 = vpop.f32.mrf.mxu0 }
  0xab   :  { %v1096_v49 = vadd.f32 %v808_v41, %v184_v33 }
  0xad   :  { %v254_v55 = vmul.f32 %v246_v48, %v1096_v49 }
  0xaf   :  { %v262_v2 = vsel %vm219_vm0, %v254_v55, 0.0 }
  0xb0   :  { %v263_v9 = vrot.slane %v262_v2, 4 }
  0xb1   :  { %v202_v38 = vpop.f32.mrf.mxu3 }
  0xb2   :  { %v187_v37 = vpop.f32.mrf.mxu0  ;;  %v1101_v58 = vadd.f32 %v808_v41, %v202_v38  ;;  %v264_v18 = vadd.f32 %v263_v9, %v262_v2 }
  0xb3   :  { %v1092_v45 = vadd.f32 %v808_v41, %v187_v37 }
  0xb4   :  { %v260_v5 = vmul.f32 %v252_v59, %v1101_v58  ;;  %v265_v27 = vrot.slane %v264_v18, 2 }
  0xb5   :  { %v255_v50 = vmul.f32 %v247_v44, %v1092_v45 }
  0xb6   :  { %v304_v13 = vsel %vm219_vm0, %v260_v5, 0.0  ;;  %v266_v38 = vadd.f32 %v265_v27, %v264_v18 }
  0xb7   :  { %v269_v60 = vsel %vm219_vm0, %v255_v50, 0.0  ;;  %v305_v20 = vrot.slane %v304_v13, 4 }
  0xb8   :  { %v270_v4 = vrot.slane %v269_v60, 4  ;;  %v267_v42 = vrot.slane %v266_v38, 1 }
  0xb9   :  { %v205_v53 = vpop.f32.mrf.mxu3  ;;  %v306_v30 = vadd.f32 %v305_v20, %v304_v13 }
  0xba   :  { %v190_v43 = vpop.f32.mrf.mxu0  ;;  %v1106_v62 = vadd.f32 %v808_v41, %v205_v53  ;;  %v271_v12 = vadd.f32 %v270_v4, %v269_v60 }
  0xbb   :  { %v1094_v47 = vadd.f32 %v808_v41, %v190_v43  ;;  %v307_v43 = vrot.slane %v306_v30, 2  ;;  %v362_v27 = vpop.permute.xlu0 %361 }
  0xbc   :  { %v261_v8 = vmul.f32 %v253_v63, %v1106_v62  ;;  %v272_v22 = vrot.slane %v271_v12, 2  ;;  %v268_v63 = vadd.f32 %v267_v42, %v266_v38 }
  0xbd   :  { %v256_v52 = vmul.f32 %v248_v46, %v1094_v47  ;;  %v308_v55 = vadd.f32 %v307_v43, %v306_v30 }
  0xbe   :  { %v311_v17 = vsel %vm219_vm0, %v261_v8, 0.0  ;;  %v273_v32 = vadd.f32 %v272_v22, %v271_v12  ;;  %v318_v8 = vmul.f32 0.17677669, %v268_v63 }
  0xbf   :  { %v276_v0 = vsel %vm219_vm0, %v256_v52, 0.0  ;;  %v312_v23 = vrot.slane %v311_v17, 4  ;;  %v309_v2 = vrot.slane %v308_v55, 1 }
  0xc0   :  { %v277_v6 = vrot.slane %v276_v0, 4  ;;  %v274_v46 = vrot.slane %v273_v32, 1 }
  0xc1   :  { %v313_v34 = vadd.f32 %v312_v23, %v311_v17 }
  0xc2   :  { %v193_v57 = vpop.f32.mrf.mxu0  ;;  %v278_v15 = vadd.f32 %v277_v6, %v276_v0 }
  0xc3   :  { %v1104_v61 = vadd.f32 %v808_v41, %v193_v57  ;;  %v314_v50 = vrot.slane %v313_v34, 2  ;;  %v275_v57 = vadd.f32 %v274_v46, %v273_v32 }
  0xc4   :  { %v279_v25 = vrot.slane %v278_v15, 2 }
  0xc5   :  { %v257_v3 = vmul.f32 %v249_v56, %v1104_v61  ;;  %v319_v4 = vmul.f32 0.17677669, %v275_v57 }
  0xc6   :  { %v280_v36 = vadd.f32 %v279_v25, %v278_v15 }
  0xc7   :  { %v283_v7 = vsel %vm219_vm0, %v257_v3, 0.0  ;;  %v335_v15 = vsel %vm334_vm2, %v319_v4, %v318_v8 }
  0xc8   :  { %v284_v10 = vrot.slane %v283_v7, 4  ;;  %v281_v51 = vrot.slane %v280_v36, 1 }
  0xca   :  { %v196_v14 = vpop.f32.mrf.mxu0  ;;  %v285_v19 = vadd.f32 %v284_v10, %v283_v7  ;;  %v282_v60 = vadd.f32 %v281_v51, %v280_v36 }
  0xcb   :  { %v1115_v16 = vadd.f32 %v808_v41, %v196_v14 }
  0xcc   :  { %v286_v28 = vrot.slane %v285_v19, 2  ;;  %v320_v7 = vmul.f32 0.17677669, %v282_v60 }
  0xcd   :  { %v258_v21 = vmul.f32 %v250_v11, %v1115_v16  ;;  %v310_v11 = vadd.f32 %v309_v2, %v308_v55 }
  0xce   :  { %v287_v39 = vadd.f32 %v286_v28, %v285_v19  ;;  %v337_v17 = vsel %vm336_vm3, %v320_v7, %v335_v15 }
  0xcf   :  { %v290_v26 = vsel %vm219_vm0, %v258_v21, 0.0  ;;  %v324_v20 = vmul.f32 0.17677669, %v310_v11 }
  0xd0   :  { %v291_v29 = vrot.slane %v290_v26, 4  ;;  %v288_v53 = vrot.slane %v287_v39, 1 }
  0xd2   :  { %v292_v33 = vadd.f32 %v291_v29, %v290_v26  ;;  %v199_v35 = vpop.f32.mrf.mxu0  ;;  %v289_v0 = vadd.f32 %v288_v53, %v287_v39 }
  0xd3   :  { %v1120_v37 = vadd.f32 %v808_v41, %v199_v35  ;;  %v315_v41 = vadd.f32 %v314_v50, %v313_v34 }
  0xd4   :  { %v293_v40 = vrot.slane %v292_v33, 2  ;;  %v321_v10 = vmul.f32 0.17677669, %v289_v0 }
  0xd5   :  { %v259_v44 = vmul.f32 %v251_v31, %v1120_v37  ;;  %v316_v6 = vrot.slane %v315_v41, 1 }
  0xd6   :  { %v294_v48 = vadd.f32 %v293_v40, %v292_v33  ;;  %v339_v19 = vsel %vm338_vm4, %v321_v10, %v337_v17 }
  0xd7   :  { %v297_v52 = vsel %vm219_vm0, %v259_v44, 0.0  ;;  %v317_v14 = vadd.f32 %v316_v6, %v315_v41 }
  0xd8   :  { %v298_v54 = vrot.slane %v297_v52, 4  ;;  %v295_v56 = vrot.slane %v294_v48, 1 }
  0xd9   :  { %v325_v22 = vmul.f32 0.17677669, %v317_v14 }
  0xda   :  { %v299_v59 = vadd.f32 %v298_v54, %v297_v52  ;;  %v296_v3 = vadd.f32 %v295_v56, %v294_v48 }
  0xdc   :  { %v300_v1 = vrot.slane %v299_v59, 2  ;;  %v322_v12 = vmul.f32 0.17677669, %v296_v3  ;;  %v1141_v3 = vstv %s763_s21 }
  0xde   :  { %v301_v5 = vadd.f32 %v300_v1, %v299_v59  ;;  %v341_v21 = vsel %vm340_vm5, %v322_v12, %v339_v19 }
  0xe0   :  { %v302_v9 = vrot.slane %v301_v5, 1 }
  0xe2   :  { %v303_v13 = vadd.f32 %v302_v9, %v301_v5 }
  0xe4   :  { %v323_v18 = vmul.f32 0.17677669, %v303_v13 }
  0xe6   :  { %v343_v23 = vsel %vm342_vm6, %v323_v18, %v341_v21 }
  0xe7   :  { %v345_v24 = vsel %vm344_vm7, %v324_v20, %v343_v23 }
  0xe8   :  { %v347_v25 = vsel %vm346_vm8, %v325_v22, %v345_v24 }
  0xe9   :  { %348 = vrot.lane.b32.xlu2 %v347_v25, %s986_s20 }
 0x143   :  { %v349_v26 = vpop.permute.xlu2 %348 }
 0x144   :  { %v353_v28 = vmul.f32 %v349_v26, %v1094_v47  ;;  %v352_v29 = vmul.f32 %v349_v26, %v1092_v45  ;;  %v351_v30 = vmul.f32 %v349_v26, %v1096_v49  ;;  %v356_v34 = vmul.f32 %v349_v26, %v1120_v37 }
 0x145   :  { %v354_v35 = vmul.f32 %v349_v26, %v1104_v61  ;;  %v355_v36 = vmul.f32 %v349_v26, %v1115_v16  ;;  %v357_v43 = vmul.f32 %v349_v26, %v1101_v58  ;;  %v358_v46 = vmul.f32 %v349_v26, %v1106_v62 }
 0x146   :  { %v366_v31 = vmul.f32 %v362_v27, %v353_v28  ;;  %v365_v32 = vmul.f32 %v362_v27, %v352_v29  ;;  %v364_v33 = vmul.f32 %v362_v27, %v351_v30  ;;  %v369_v38 = vmul.f32 %v362_v27, %v356_v34 }
 0x147   :  { %v367_v39 = vmul.f32 %v362_v27, %v354_v35  ;;  %v368_v40 = vmul.f32 %v362_v27, %v355_v36  ;;  %v370_v44 = vmul.f32 %v362_v27, %v357_v43  ;;  %v371_v48 = vmul.f32 %v362_v27, %v358_v46 }
 0x148   :  { %384 = vrot.lane.b32.xlu0 %v366_v31, %s987_s3  ;;  %382 = vrot.lane.b32.xlu2 %v365_v32, %s987_s3 }
 0x149   :  { %380 = vrot.lane.b32.xlu1 %v364_v33, %s987_s3 }
 0x150   :  { %390 = vrot.lane.b32.xlu0 %v369_v38, %s987_s3  ;;  %386 = vrot.lane.b32.xlu2 %v367_v39, %s987_s3 }
 0x151   :  { %388 = vrot.lane.b32.xlu1 %v368_v40, %s987_s3 }
 0x159   :  { %392 = vrot.lane.b32.xlu1 %v370_v44, %s987_s3 }
 0x161   :  { %394 = vrot.lane.b32.xlu1 %v371_v48, %s987_s3 }
 0x1a2   :  { %v383_v50 = vpop.permute.xlu2 %382 }
 0x1a3   :  { %v407_v51 = vsel %vm219_vm0, %v383_v50, 0.0 }
 0x1a4   :  { %408 = vadd.xlane.f32.xlu0 %v407_v51 }
 0x1aa   :  { %v387_v55 = vpop.permute.xlu2 %386 }
 0x1ab   :  { %v413_v57 = vsel %vm219_vm0, %v387_v55, 0.0 }
 0x1ba   :  { %v385_v52 = vpop.permute.xlu0 %384 }
 0x1bb   :  { %v381_v42 = vpop.permute.xlu1 %380  ;;  %v410_v53 = vsel %vm219_vm0, %v385_v52, 0.0 }
 0x1bc   :  { %411 = vadd.xlane.f32.xlu1 %v410_v53  ;;  %v404_v54 = vsel %vm219_vm0, %v381_v42, 0.0 }
 0x1bd   :  { %405 = vadd.xlane.f32.xlu2 %v404_v54 }
 0x1c2   :  { %v391_v59 = vpop.permute.xlu0 %390 }
 0x1c3   :  { %v389_v56 = vpop.permute.xlu1 %388  ;;  %v419_v63 = vsel %vm219_vm0, %v391_v59, 0.0 }
 0x1c4   :  { %v416_v41 = vsel %vm219_vm0, %v389_v56, 0.0 }
 0x1c5   :  { %414 = vadd.xlane.f32.xlu2 %v413_v57  ;;  %417 = vadd.xlane.f32.xlu0 %v416_v41 }
 0x1cb   :  { %v393_v60 = vpop.permute.xlu1 %392 }
 0x1cc   :  { %v422_v0 = vsel %vm219_vm0, %v393_v60, 0.0 }
 0x1cd   :  { %420 = vadd.xlane.f32.xlu2 %v419_v63  ;;  %423 = vadd.xlane.f32.xlu0 %v422_v0 }
 0x1d3   :  { %v395_v1 = vpop.permute.xlu1 %394 }
 0x1d4   :  { %v425_v2 = vsel %vm219_vm0, %v395_v1, 0.0 }
 0x1d5   :  { %426 = vadd.xlane.f32.xlu2 %v425_v2 }
 0x217   :  { %v409_v4 = vpop.xlane.xlu0 %408 }
 0x218   :  { %v431_v5 = vadd.f32 %v1141_v3, %v409_v4 }
 0x21a   :  { %v439_v6 = vmul.f32 %v431_v5, %v1092_v45 }
 0x21c   :  { %v454_v7 = vsel %vm446_vm9, %v439_v6, 0.0 }
 0x21d   :  { %v455_v8 = vrot.slane %v454_v7, 4 }
 0x21f   :  { %v456_v9 = vadd.f32 %v455_v8, %v454_v7 }
 0x221   :  { %v457_v10 = vrot.slane %v456_v9, 2 }
 0x223   :  { %v458_v11 = vadd.f32 %v457_v10, %v456_v9 }
 0x225   :  { %v459_v12 = vrot.slane %v458_v11, 1 }
 0x227   :  { %v460_v13 = vadd.f32 %v459_v12, %v458_v11 }
 0x229   :  { %v504_v14 = vmul.f32 0.4204482, %v460_v13 }
 0x22b   :  { %521 = vrot.lane.b32.xlu0 %v504_v14, %s986_s20 }
 0x22f   :  { %v412_v15 = vpop.xlane.xlu1 %411 }
 0x230   :  { %v406_v17 = vpop.xlane.xlu2 %405  ;;  %v432_v18 = vadd.f32 %v1141_v3, %v412_v15 }
 0x231   :  { %v430_v19 = vadd.f32 %v1141_v3, %v406_v17 }
 0x232   :  { %v440_v20 = vmul.f32 %v432_v18, %v1094_v47 }
 0x233   :  { %v438_v21 = vmul.f32 %v430_v19, %v1096_v49 }
 0x234   :  { %v461_v22 = vsel %vm446_vm9, %v440_v20, 0.0 }
 0x235   :  { %v447_v23 = vsel %vm446_vm9, %v438_v21, 0.0  ;;  %v462_v24 = vrot.slane %v461_v22, 4 }
 0x236   :  { %v448_v25 = vrot.slane %v447_v23, 4 }
 0x237   :  { %v463_v26 = vadd.f32 %v462_v24, %v461_v22 }
 0x238   :  { %v449_v27 = vadd.f32 %v448_v25, %v447_v23  ;;  %v415_v28 = vpop.xlane.xlu2 %414  ;;  %v418_v29 = vpop.xlane.xlu0 %417 }
 0x239   :  { %v464_v30 = vrot.slane %v463_v26, 2  ;;  %v433_v31 = vadd.f32 %v1141_v3, %v415_v28  ;;  %v434_v32 = vadd.f32 %v1141_v3, %v418_v29 }
 0x23a   :  { %v450_v33 = vrot.slane %v449_v27, 2 }
 0x23b   :  { %v441_v34 = vmul.f32 %v433_v31, %v1104_v61  ;;  %v442_v35 = vmul.f32 %v434_v32, %v1115_v16  ;;  %v465_v36 = vadd.f32 %v464_v30, %v463_v26 }
 0x23c   :  { %v451_v38 = vadd.f32 %v450_v33, %v449_v27 }
 0x23d   :  { %v468_v39 = vsel %vm446_vm9, %v441_v34, 0.0  ;;  %v475_v40 = vsel %vm446_vm9, %v442_v35, 0.0  ;;  %v466_v43 = vrot.slane %v465_v36, 1 }
 0x23e   :  { %v469_v44 = vrot.slane %v468_v39, 4  ;;  %v476_v46 = vrot.slane %v475_v40, 4  ;;  %v452_v48 = vrot.slane %v451_v38, 1 }
 0x23f   :  { %v467_v50 = vadd.f32 %v466_v43, %v465_v36 }
 0x240   :  { %v470_v51 = vadd.f32 %v469_v44, %v468_v39  ;;  %v477_v52 = vadd.f32 %v476_v46, %v475_v40  ;;  %v421_v42 = vpop.xlane.xlu2 %420  ;;  %v424_v53 = vpop.xlane.xlu0 %423  ;;  %v453_v54 = vadd.f32 %v452_v48, %v451_v38 }
 0x241   :  { %v435_v55 = vadd.f32 %v1141_v3, %v421_v42  ;;  %v436_v56 = vadd.f32 %v1141_v3, %v424_v53  ;;  %v505_v57 = vmul.f32 0.4204482, %v467_v50  ;;  %v553_v53 = vld [vmem:[#allocation10 + $0x10] sm:$0xff] }
 0x242   :  { %v471_v41 = vrot.slane %v470_v51, 2  ;;  %v478_v59 = vrot.slane %v477_v52, 2  ;;  %v503_v60 = vmul.f32 0.4204482, %v453_v54  ;;  %v552_v54 = vld [vmem:[#allocation10 + $0x8] sm:$0xff] }
 0x243   :  { %v443_v63 = vmul.f32 %v435_v55, %v1120_v37  ;;  %v444_v0 = vmul.f32 %v436_v56, %v1101_v58  ;;  %523 = vrot.lane.b32.xlu2 %v505_v57, %s986_s20 }
 0x244   :  { %519 = vrot.lane.b32.xlu1 %v503_v60, %s986_s20  ;;  %v479_v1 = vadd.f32 %v478_v59, %v477_v52  ;;  %v472_v2 = vadd.f32 %v471_v41, %v470_v51  ;;  %v655_v41 = vld [vmem:[#allocation12 + $0x38] sm:$0xff]  ;;  %v654_v59 = vld [vmem:[#allocation12 + $0x30] sm:$0xff]  ;;  %v653_v60 = vld [vmem:[#allocation12 + $0x28] sm:$0xff] }
 0x245   :  { %v482_v4 = vsel %vm446_vm9, %v443_v63, 0.0  ;;  %v489_v5 = vsel %vm446_vm9, %v444_v0, 0.0  ;;  %692 = vmatpush.msra.mxu2 %v655_v41  ;;  %788 = vmatpush.msrb.mxu3 %v655_v41  ;;  %v652_v63 = vld [vmem:[#allocation12 + $0x20] sm:$0xff]  ;;  %v651_v0 = vld [vmem:[#allocation12 + $0x18] sm:$0xff] }
 0x246   :  { %v483_v6 = vrot.slane %v482_v4, 4  ;;  %v490_v7 = vrot.slane %v489_v5, 4  ;;  %v480_v8 = vrot.slane %v479_v1, 1  ;;  %v473_v9 = vrot.slane %v472_v2, 1 }
 0x247   :  { %693 = vmatpush.msra.mxu2 %v654_v59  ;;  %789 = vmatpush.msrb.mxu3 %v654_v59 }
 0x248   :  { %v484_v10 = vadd.f32 %v483_v6, %v482_v4  ;;  %v491_v11 = vadd.f32 %v490_v7, %v489_v5  ;;  %v427_v12 = vpop.xlane.xlu2 %426  ;;  %v481_v13 = vadd.f32 %v480_v8, %v479_v1  ;;  %v474_v14 = vadd.f32 %v473_v9, %v472_v2  ;;  %v650_v5 = vld [vmem:[#allocation12 + $0x10] sm:$0xff]  ;;  %v649_v6 = vld [vmem:[#allocation12 + $0x8] sm:$0xff]  ;;  %v648_v7 = vld [vmem:[#allocation12] sm:$0xff] }
 0x249   :  { %v437_v15 = vadd.f32 %v1141_v3, %v427_v12  ;;  %694 = vmatpush.msra.mxu2 %v653_v60  ;;  %790 = vmatpush.msrb.mxu3 %v653_v60  ;;  %v810_v8 = vld [vmem:[%s1225_s6] ss:$0 sm:$0xff] }
 0x24a   :  { %v485_v17 = vrot.slane %v484_v10, 2  ;;  %v492_v18 = vrot.slane %v491_v11, 2  ;;  %v507_v19 = vmul.f32 0.4204482, %v481_v13  ;;  %v506_v20 = vmul.f32 0.4204482, %v474_v14 }
 0x24b   :  { %v445_v21 = vmul.f32 %v437_v15, %v1106_v62  ;;  %695 = vmatpush.msra.mxu2 %v652_v63  ;;  %791 = vmatpush.msrb.mxu3 %v652_v63 }
 0x24c   :  { %527 = vrot.lane.b32.xlu1 %v507_v19, %s986_s20  ;;  %525 = vrot.lane.b32.xlu0 %v506_v20, %s986_s20  ;;  %v493_v22 = vadd.f32 %v492_v18, %v491_v11  ;;  %v486_v23 = vadd.f32 %v485_v17, %v484_v10 }
 0x24d   :  { %v496_v24 = vsel %vm446_vm9, %v445_v21, 0.0  ;;  %696 = vmatpush.msra.mxu2 %v651_v0  ;;  %792 = vmatpush.msrb.mxu3 %v651_v0 }
 0x24e   :  { %v494_v25 = vrot.slane %v493_v22, 1  ;;  %v487_v26 = vrot.slane %v486_v23, 1  ;;  %v497_v34 = vrot.slane %v496_v24, 4 }
 0x24f   :  { %697 = vmatpush.msra.mxu2 %v650_v5  ;;  %793 = vmatpush.msrb.mxu3 %v650_v5 }
 0x250   :  { %v495_v27 = vadd.f32 %v494_v25, %v493_v22  ;;  %v488_v28 = vadd.f32 %v487_v26, %v486_v23  ;;  %v498_v35 = vadd.f32 %v497_v34, %v496_v24  ;;  %v811_v34 = vld [vmem:[%s1227_s8] ss:$0 sm:$0xff]  ;;  %s988_s8 = smov [#allocation13]  }
 0x251   :  { %698 = vmatpush.msra.mxu2 %v649_v6  ;;  %794 = vmatpush.msrb.mxu3 %v649_v6  ;;  %s737_s23 = sshll.u32 %s988_s8, 4  ;;  %s738_s23 = int_to_ptr.vmem [resolvable:$true] %s737_s23 }
 0x252   :  { %v509_v29 = vmul.f32 0.4204482, %v495_v27  ;;  %v508_v3 = vmul.f32 0.4204482, %v488_v28  ;;  %v499_v38 = vrot.slane %v498_v35, 2 }
 0x253   :  { %699 = vmatpush.msra.mxu2 %v648_v7  ;;  %795 = vmatpush.msrb.mxu3 %v648_v7 }
 0x254   :  { %531 = vrot.lane.b32.xlu1 %v509_v29, %s986_s20  ;;  %529 = vrot.lane.b32.xlu2 %v508_v3, %s986_s20  ;;  %v500_v40 = vadd.f32 %v499_v38, %v498_v35 }
 0x256   :  { %v501_v46 = vrot.slane %v500_v40, 1 }
 0x29d   :  { %v522_v30 = vpop.permute.xlu0 %521  ;;  %v524_v31 = vpop.permute.xlu2 %523 }
 0x29e   :  { %v544_v32 = vmul.f32 %v522_v30, %v1092_v45  ;;  %v545_v33 = vmul.f32 %v524_v31, %v1094_v47  ;;  %v502_v45 = vadd.f32 %v501_v46, %v500_v40 }
 0x2a0   :  { %569 = vrot.lane.b32.xlu2 %v544_v32, %s986_s20  ;;  %571 = vrot.lane.b32.xlu1 %v545_v33, %s986_s20  ;;  %v510_v51 = vmul.f32 0.4204482, %v502_v45 }
 0x2ae   :  { %v530_v36 = vpop.permute.xlu2 %529 }
 0x2af   :  { %v548_v39 = vmul.f32 %v530_v36, %v1120_v37 }
 0x2b1   :  { %577 = vrot.lane.b32.xlu1 %v548_v39, %s986_s20 }
 0x2b6   :  { %v520_v43 = vpop.permute.xlu1 %519 }
 0x2b7   :  { %v543_v44 = vmul.f32 %v520_v43, %v1096_v49  ;;  %v554_v49 = vld [vmem:[#allocation10 + $0x18] sm:$0xff] }
 0x2b8   :  { %611 = vmatpush.msra.mxu1 %v554_v49 }
 0x2b9   :  { %567 = vrot.lane.b32.xlu0 %v543_v44, %s986_s20 }
 0x2ba   :  { %612 = vmatpush.msra.mxu1 %v553_v53 }
 0x2bc   :  { %613 = vmatpush.msra.mxu1 %v552_v54 }
 0x2be   :  { %v526_v47 = vpop.permute.xlu0 %525  ;;  %v528_v48 = vpop.permute.xlu1 %527 }
 0x2bf   :  { %v546_v50 = vmul.f32 %v526_v47, %v1104_v61  ;;  %v547_v52 = vmul.f32 %v528_v48, %v1115_v16  ;;  %v551_v61 = vld [vmem:[#allocation10] sm:$0xff] }
 0x2c0   :  { %614 = vmatpush.msra.mxu1 %v551_v61 }
 0x2c1   :  { %573 = vrot.lane.b32.xlu2 %v546_v50, %s986_s20  ;;  %533 = vrot.lane.b32.xlu0 %v510_v51, %s986_s20 }
 0x2c6   :  { %v532_v37 = vpop.permute.xlu1 %531 }
 0x2c7   :  { %v549_v42 = vmul.f32 %v532_v37, %v1101_v58 }
 0x2c9   :  { %575 = vrot.lane.b32.xlu0 %v547_v52, %s986_s20  ;;  %579 = vrot.lane.b32.xlu2 %v549_v42, %s986_s20 }
 0x2fa   :  { %v570_v56 = vpop.permute.xlu2 %569 }
 0x312   :  { %v572_v58 = vpop.permute.xlu1 %571 }
 0x31b   :  { %v574_v1 = vpop.permute.xlu2 %573 }
 0x323   :  { %v578_v2 = vpop.permute.xlu1 %577  ;;  %v580_v4 = vpop.permute.xlu2 %579 }
 0x32b   :  { %v568_v55 = vpop.permute.xlu0 %567 }
 0x32c   :  { %764 = vmatmul.msk.f32.vlgmr.msra.gmra.mxu1 %vm219_vm0, %v568_v55 }
 0x333   :  { %v534_v57 = vpop.permute.xlu0 %533 }
 0x334   :  { %v550_v16 = vmul.f32 %v534_v57, %v1106_v62  ;;  %765 = vmatmul.msk.f32.gmra.mxu1 %vm219_vm0, %v570_v56 }
 0x336   :  { %581 = vrot.lane.b32.xlu0 %v550_v16, %s986_s20 }
 0x33b   :  { %v576_v62 = vpop.permute.xlu0 %575 }
 0x33c   :  { %766 = vmatmul.msk.f32.gmra.mxu1 %vm219_vm0, %v572_v58 }
 0x344   :  { %767 = vmatmul.msk.f32.gmra.mxu1 %vm219_vm0, %v574_v1 }
 0x34c   :  { %768 = vmatmul.msk.f32.gmra.mxu1 %vm219_vm0, %v576_v62 }
 0x354   :  { %769 = vmatmul.msk.f32.gmra.mxu1 %vm219_vm0, %v578_v2 }
 0x35c   :  { %770 = vmatmul.msk.f32.gmra.mxu1 %vm219_vm0, %v580_v4 }
 0x3a8   :  { %v582_v9 = vpop.permute.xlu0 %581 }
 0x3a9   :  { %v616_v10 = vpop.f32.mrf.mxu1  ;;  %771 = vmatmul.msk.f32.gmra.mxu1 %vm219_vm0, %v582_v9 }
 0x3aa   :  { %v617_v11 = vadd.f32 %v810_v8, %v616_v10 }
 0x3ac   :  { %v640_v12 = vmax.f32 %v617_v11, 0.0 }
 0x3ae   :  { %772 = vmatmul.msk.f32.vlgmr.msra.gmra.mxu2 %vm142_vm1, %v640_v12 }
 0x3b1   :  { %v619_v13 = vpop.f32.mrf.mxu1 }
 0x3b2   :  { %v620_v14 = vadd.f32 %v810_v8, %v619_v13 }
 0x3b4   :  { %v641_v15 = vmax.f32 %v620_v14, 0.0 }
 0x3b6   :  { %773 = vmatmul.msk.f32.gmra.mxu2 %vm142_vm1, %v641_v15 }
 0x3b9   :  { %v622_v17 = vpop.f32.mrf.mxu1 }
 0x3ba   :  { %v623_v18 = vadd.f32 %v810_v8, %v622_v17 }
 0x3bc   :  { %v642_v19 = vmax.f32 %v623_v18, 0.0 }
 0x3be   :  { %774 = vmatmul.msk.f32.gmra.mxu2 %vm142_vm1, %v642_v19 }
 0x3c1   :  { %v625_v20 = vpop.f32.mrf.mxu1 }
 0x3c2   :  { %v626_v21 = vadd.f32 %v810_v8, %v625_v20 }
 0x3c4   :  { %v643_v22 = vmax.f32 %v626_v21, 0.0 }
 0x3c6   :  { %775 = vmatmul.msk.f32.gmra.mxu2 %vm142_vm1, %v643_v22 }
 0x3c9   :  { %v628_v23 = vpop.f32.mrf.mxu1 }
 0x3ca   :  { %v629_v24 = vadd.f32 %v810_v8, %v628_v23 }
 0x3cc   :  { %v644_v25 = vmax.f32 %v629_v24, 0.0 }
 0x3ce   :  { %776 = vmatmul.msk.f32.gmra.mxu2 %vm142_vm1, %v644_v25 }
 0x3d1   :  { %v631_v26 = vpop.f32.mrf.mxu1 }
 0x3d2   :  { %v632_v27 = vadd.f32 %v810_v8, %v631_v26 }
 0x3d4   :  { %v645_v28 = vmax.f32 %v632_v27, 0.0 }
 0x3d6   :  { %777 = vmatmul.msk.f32.gmra.mxu2 %vm142_vm1, %v645_v28 }
 0x3d9   :  { %v634_v29 = vpop.f32.mrf.mxu1 }
 0x3da   :  { %v635_v3 = vadd.f32 %v810_v8, %v634_v29 }
 0x3dc   :  { %v646_v30 = vmax.f32 %v635_v3, 0.0 }
 0x3de   :  { %778 = vmatmul.msk.f32.vlgmr.msrb.gmra.mxu3 %vm142_vm1, %v646_v30 }
 0x426   :  { %v637_v31 = vpop.f32.mrf.mxu1 }
 0x427   :  { %v638_v32 = vadd.f32 %v810_v8, %v637_v31 }
 0x429   :  { %v647_v33 = vmax.f32 %v638_v32, 0.0 }
 0x42b   :  { %779 = vmatmul.msk.f32.gmra.mxu3 %vm142_vm1, %v647_v33 }
 0x431   :  { %v701_v35 = vpop.f32.mrf.mxu2 }
 0x432   :  { %v702_v36 = vadd.f32 %v811_v34, %v701_v35 }
 0x434   :  { %725 = vst [vmem:[#allocation13] sm:$0xff] %v702_v36 }
 0x439   :  { %v704_v38 = vpop.f32.mrf.mxu2 }
 0x43a   :  { %v705_v39 = vadd.f32 %v811_v34, %v704_v38 }
 0x43c   :  { %726 = vst [vmem:[#allocation13 + $0x8] sm:$0xff] %v705_v39 }
 0x441   :  { %v707_v40 = vpop.f32.mrf.mxu2 }
 0x442   :  { %v708_v43 = vadd.f32 %v811_v34, %v707_v40 }
 0x444   :  { %727 = vst [vmem:[#allocation13 + $0x10] sm:$0xff] %v708_v43 }
 0x449   :  { %v710_v44 = vpop.f32.mrf.mxu2 }
 0x44a   :  { %v711_v46 = vadd.f32 %v811_v34, %v710_v44 }
 0x44c   :  { %728 = vst [vmem:[#allocation13 + $0x18] sm:$0xff] %v711_v46 }
 0x451   :  { %v713_v45 = vpop.f32.mrf.mxu2 }
 0x452   :  { %v714_v47 = vadd.f32 %v811_v34, %v713_v45 }
 0x454   :  { %729 = vst [vmem:[#allocation13 + $0x20] sm:$0xff] %v714_v47 }
 0x459   :  { %v716_v48 = vpop.f32.mrf.mxu2 }
 0x45a   :  { %v717_v50 = vadd.f32 %v811_v34, %v716_v48 }
 0x45c   :  { %730 = vst [vmem:[#allocation13 + $0x28] sm:$0xff] %v717_v50 }
 0x461   :  { %v719_v51 = vpop.f32.mrf.mxu3 }
 0x462   :  { %v720_v37 = vadd.f32 %v811_v34, %v719_v51 }
 0x464   :  { %731 = vst [vmem:[#allocation13 + $0x30] sm:$0xff] %v720_v37 }
 0x4ae   :  { %v722_v52 = vpop.f32.mrf.mxu3 }
 0x4af   :  { %v723_v42 = vadd.f32 %v811_v34, %v722_v52 }
 0x4b1   :  { %732 = vst [vmem:[#allocation13 + $0x38] sm:$0xff] %v723_v42 }
 0x4b2   :  { %745 = dma.vmem_to_hbm [thread:$0]  %s738_s23, 1024, %s740_s26, [#allocation4], %s979_s17, %s979_s17, %s980_s18  }
 0x4b3   :  { %976 = dma.done.wait [#allocation4], 1024  }
 0x4b4   :  { %977 = vsyncadd [#allocation4], 4294966272 }
 0x4b5   :  { %750 = vsyncpa [#allocation3], 1 }
 0x4b6   :  { %751 = vsyncpa [#allocation7], 1 }
 0x4b7   :  { %752 = vsyncpa [#allocation11], 1 }
 0x4b8   :  { %753 = vsyncpa [#allocation4], 1 }
 0x4b9   :  { %754 = vsyncpa [#allocation5], 1 }

</bundles_post_ra>
